<compile_context>
chip_gen: v7x
topology: tpu7x:2x2x1
jax: 0.10.0
libtpu: 0.0.40
codegen_flags: <defaults>
</compile_context>

<pallas_src>
import functools

import jax
import jax.numpy as jnp
from jax import lax
from jax.experimental import pallas as pl
from jax.experimental.pallas import tpu as pltpu

EPS = 1e-5  # nn.BatchNorm1d default eps


def _se_block_kernel(x_ref, w1t_ref, gamma_ref, beta_ref, w2t_ref, b2_ref,
                     o_ref, acc_ref, *, inv_hw):
    """Fused global-avg-pool + Linear + BatchNorm1d(train) + ReLU + Linear.

    x_ref:     (N, C, T)  spatial tile of the flattened NCHW input
    w1t_ref:   (C, C)     Linear #1 weight, pre-transposed to (in, out)
    gamma_ref: (1, C)     BN weight
    beta_ref:  (1, C)     BN bias
    w2t_ref:   (C, C)     Linear #2 weight, pre-transposed to (in, out)
    b2_ref:    (1, C)     Linear #2 bias
    o_ref:     (N, C)     output (channel weights)
    acc_ref:   (N, C) f32 VMEM scratch -- running spatial sum for the pool
    """
    s = pl.program_id(0)

    @pl.when(s == 0)
    def _():
        acc_ref[...] = jnp.zeros_like(acc_ref)

    # Partial spatial sum of this tile (lane axis = spatial, XLU reduce).
    acc_ref[...] += jnp.sum(x_ref[...].astype(jnp.float32), axis=-1)

    @pl.when(s == pl.num_programs(0) - 1)
    def _():
        # AdaptiveAvgPool2d((1,1)) + Flatten
        pooled = acc_ref[...] * inv_hw                       # (N, C)

        # Linear #1.  Its bias is omitted: a per-feature constant added before
        # a training-mode BatchNorm1d is exactly cancelled by the mean
        # subtraction (pure dead work).
        y1 = jnp.dot(pooled, w1t_ref[...],
                     preferred_element_type=jnp.float32)     # (N, C)

        # BatchNorm1d, training mode: per-feature batch stats over N,
        # biased variance (PyTorch normalization semantics).
        mean = jnp.mean(y1, axis=0, keepdims=True)
        var = jnp.mean((y1 - mean) ** 2, axis=0, keepdims=True)
        h = (y1 - mean) * lax.rsqrt(var + EPS) * gamma_ref[...] + beta_ref[...]

        # ReLU
        h = jnp.maximum(h, 0.0)

        # Linear #2 (bias kept -- nothing cancels it here).
        out = jnp.dot(h, w2t_ref[...], preferred_element_type=jnp.float32)
        o_ref[...] = (out + b2_ref[...]).astype(o_ref.dtype)


def squeeze_and_extraction_forward(x_nchw, w1, b1, gamma, beta, w2, b2):
    """x_nchw: (N, C, H, W) with C = 2*feature.  Returns (N, C).

    w1, w2: (C, C) PyTorch (out_features, in_features) layout.
    b1 is accepted for interface parity but not used (exactly cancelled by the
    training-mode BatchNorm1d that follows Linear #1).
    """
    del b1
    N, C, H, W = x_nchw.shape
    HW = H * W

    # Contiguous reshape only (no transpose / no extra HBM materialization):
    # spatial goes on the 128-wide lane axis -> lane-dense input tiles.
    x_flat = x_nchw.reshape(N, C, HW)

    # Pre-transpose weights to (in, out) so the kernel does rows @ W.
    w1t = jnp.transpose(w1)
    w2t = jnp.transpose(w2)

    # Spatial tiling for the pooling reduction (pipelined, double-buffered).
    tile = 128 if HW % 128 == 0 else HW
    grid = (HW // tile,)

    kernel = functools.partial(_se_block_kernel, inv_hw=1.0 / float(HW))

    out = pl.pallas_call(
        kernel,
        out_shape=jax.ShapeDtypeStruct((N, C), jnp.float32),
        grid_spec=pltpu.PrefetchScalarGridSpec(
            num_scalar_prefetch=0,
            grid=grid,
            in_specs=[
                pl.BlockSpec((N, C, tile), lambda s: (0, 0, s)),  # x tile
                pl.BlockSpec((C, C), lambda s: (0, 0)),           # w1t
                pl.BlockSpec((1, C), lambda s: (0, 0)),           # gamma
                pl.BlockSpec((1, C), lambda s: (0, 0)),           # beta
                pl.BlockSpec((C, C), lambda s: (0, 0)),           # w2t
                pl.BlockSpec((1, C), lambda s: (0, 0)),           # b2
            ],
            out_specs=pl.BlockSpec((N, C), lambda s: (0, 0)),
            scratch_shapes=[pltpu.VMEM((N, C), jnp.float32)],
        ),
        compiler_params=pltpu.CompilerParams(
            dimension_semantics=("arbitrary",),  # reduction axis
        ),
    )(
        x_flat,
        w1t,
        gamma.reshape(1, C),
        beta.reshape(1, C),
        w2t,
        b2.reshape(1, C),
    )
    return out


def _reference(x_nchw, w1, b1, gamma, beta, w2, b2):
    """Pure-JAX reference mirroring PyTorch semantics (bias b1 included)."""
    pooled = jnp.mean(x_nchw, axis=(2, 3))                   # AdaptiveAvgPool + Flatten
    y1 = pooled @ w1.T + b1                                  # Linear #1
    mean = jnp.mean(y1, axis=0, keepdims=True)               # BN1d training stats
    var = jnp.mean((y1 - mean) ** 2, axis=0, keepdims=True)
    h = (y1 - mean) * lax.rsqrt(var + EPS) * gamma[None, :] + beta[None, :]
    h = jnp.maximum(h, 0.0)                                  # ReLU
    return h @ w2.T + b2                                     # Linear #2


if __name__ == "__main__":
    key = jax.random.PRNGKey(0)
    k_x, k_w1, k_b1, k_g, k_be, k_w2, k_b2 = jax.random.split(key, 7)

    feature = 16
    N, C, H, W = 2, 2 * feature, 16, 16    # BatchNorm1d(training) needs N > 1

    x = jax.random.normal(k_x, (N, C, H, W), dtype=jnp.float32)

    # Parameter shapes match nn.Linear / nn.BatchNorm1d.
    w1 = 0.1 * jax.random.normal(k_w1, (C, C), dtype=jnp.float32)
    b1 = 0.01 * jax.random.normal(k_b1, (C,), dtype=jnp.float32)
    gamma = 1.0 + 0.1 * jax.random.normal(k_g, (C,), dtype=jnp.float32)
    beta = 0.1 * jax.random.normal(k_be, (C,), dtype=jnp.float32)
    w2 = 0.1 * jax.random.normal(k_w2, (C, C), dtype=jnp.float32)
    b2 = 0.01 * jax.random.normal(k_b2, (C,), dtype=jnp.float32)

    out = squeeze_and_extraction_forward(x, w1, b1, gamma, beta, w2, b2)
    out = jax.block_until_ready(out)

    ref = jax.block_until_ready(_reference(x, w1, b1, gamma, beta, w2, b2))
    assert out.shape == (N, C)
    assert jnp.allclose(out, ref, atol=1e-4, rtol=1e-4), (
        float(jnp.max(jnp.abs(out - ref)))
    )

    print("KERNEL_OK")
</pallas_src>

<mosaic_0001>
module attributes {stable_mosaic.version = 11 : i64} {
  func.func @_se_block_kernel(%arg0: i32, %arg1: memref<2x32x128xf32, #tpu.memory_space<vmem>>, %arg2: memref<32x32xf32, #tpu.memory_space<vmem>>, %arg3: memref<1x32xf32, #tpu.memory_space<vmem>>, %arg4: memref<1x32xf32, #tpu.memory_space<vmem>>, %arg5: memref<32x32xf32, #tpu.memory_space<vmem>>, %arg6: memref<1x32xf32, #tpu.memory_space<vmem>>, %arg7: memref<2x32xf32, #tpu.memory_space<vmem>>, %arg8: memref<2x32xf32, #tpu.memory_space<vmem>>) attributes {dimension_semantics = [#tpu.dimension_semantics<arbitrary>], iteration_bounds = array<i64: 2>, scalar_prefetch = 0 : i64, scratch_operands = 1 : i64, tpu.core_type = #tpu.core_type<tc>, window_params = [{transform_indices = @transform_0, window_bounds = array<i64: 2, 32, 128>}, {pipeline_mode = #tpu.pipeline_mode<synchronous>, transform_indices = @transform_1, window_bounds = array<i64: 32, 32>}, {pipeline_mode = #tpu.pipeline_mode<synchronous>, transform_indices = @transform_2, window_bounds = array<i64: 1, 32>}, {pipeline_mode = #tpu.pipeline_mode<synchronous>, transform_indices = @transform_3, window_bounds = array<i64: 1, 32>}, {pipeline_mode = #tpu.pipeline_mode<synchronous>, transform_indices = @transform_4, window_bounds = array<i64: 32, 32>}, {pipeline_mode = #tpu.pipeline_mode<synchronous>, transform_indices = @transform_5, window_bounds = array<i64: 1, 32>}, {pipeline_mode = #tpu.pipeline_mode<synchronous>, transform_indices = @transform_6, window_bounds = array<i64: 2, 32>}]} {
    %c0_i32 = arith.constant 0 : i32
    %0 = arith.cmpi eq, %arg0, %c0_i32 : i32
    %1 = arith.extui %0 : i1 to i32
    %c0_i32_0 = arith.constant 0 : i32
    %2 = arith.cmpi ne, %1, %c0_i32_0 : i32
    scf.if %2 {
      %cst_8 = arith.constant 0.000000e+00 : f32
      %11 = vector.broadcast %cst_8 : f32 to vector<2x32xf32>
      %c0_9 = arith.constant 0 : index
      %c0_10 = arith.constant 0 : index
      %12 = vector.load %arg8[%c0_9, %c0_10] : memref<2x32xf32, #tpu.memory_space<vmem>>, vector<2x32xf32>
      tpu.vector_store %arg8[%c0_9, %c0_10], %11 {strides = array<i32>} : memref<2x32xf32, #tpu.memory_space<vmem>>, vector<2x32xf32>,
    } else {
    }
    %c0 = arith.constant 0 : index
    %c0_1 = arith.constant 0 : index
    %3 = vector.load %arg8[%c0, %c0_1] : memref<2x32xf32, #tpu.memory_space<vmem>>, vector<2x32xf32>
    %c0_2 = arith.constant 0 : index
    %c0_3 = arith.constant 0 : index
    %c0_4 = arith.constant 0 : index
    %4 = vector.load %arg1[%c0_2, %c0_3, %c0_4] : memref<2x32x128xf32, #tpu.memory_space<vmem>>, vector<2x32x128xf32>
    %cst = arith.constant dense<0.000000e+00> : vector<2x32xf32>
    %5 = vector.multi_reduction <add>, %4, %cst [2] : vector<2x32x128xf32> to vector<2x32xf32>
    %6 = arith.addf %3, %5 : vector<2x32xf32>
    %c0_5 = arith.constant 0 : index
    %c0_6 = arith.constant 0 : index
    %7 = vector.load %arg8[%c0_5, %c0_6] : memref<2x32xf32, #tpu.memory_space<vmem>>, vector<2x32xf32>
    tpu.vector_store %arg8[%c0_5, %c0_6], %6 {strides = array<i32>} : memref<2x32xf32, #tpu.memory_space<vmem>>, vector<2x32xf32>,
    %c1_i32 = arith.constant 1 : i32
    %8 = arith.cmpi eq, %arg0, %c1_i32 : i32
    %9 = arith.extui %8 : i1 to i32
    %c0_i32_7 = arith.constant 0 : i32
    %10 = arith.cmpi ne, %9, %c0_i32_7 : i32
    scf.if %10 {
      %c0_8 = arith.constant 0 : index
      %c0_9 = arith.constant 0 : index
      %11 = vector.load %arg8[%c0_8, %c0_9] : memref<2x32xf32, #tpu.memory_space<vmem>>, vector<2x32xf32>
      %cst_10 = arith.constant 3.906250e-03 : f32
      %12 = vector.broadcast %cst_10 : f32 to vector<2x32xf32>
      %13 = arith.mulf %11, %12 : vector<2x32xf32>
      %c0_11 = arith.constant 0 : index
      %c0_12 = arith.constant 0 : index
      %14 = vector.load %arg2[%c0_11, %c0_12] : memref<32x32xf32, #tpu.memory_space<vmem>>, vector<32x32xf32>
      %cst_13 = arith.constant dense<0.000000e+00> : vector<2x32xf32>
      %15 = tpu.matmul %13, %14, %cst_13 {dimension_numbers = #tpu.dot_dimension_numbers<[1], [0], [0], [1], [0, 0, 1, 1], [], []>} : vector<2x32xf32>, vector<32x32xf32>, vector<2x32xf32> -> vector<2x32xf32>
      %cst_14 = arith.constant dense<0.000000e+00> : vector<32xf32>
      %16 = vector.multi_reduction <add>, %15, %cst_14 [0] : vector<2x32xf32> to vector<32xf32>
      %17 = vector.shape_cast %16 : vector<32xf32> to vector<1x32xf32>
      %cst_15 = arith.constant 2.000000e+00 : f32
      %18 = vector.broadcast %cst_15 : f32 to vector<1x32xf32>
      %19 = arith.divf %17, %18 : vector<1x32xf32>
      %20 = vector.broadcast %19 : vector<1x32xf32> to vector<2x32xf32>
      %21 = arith.subf %15, %20 : vector<2x32xf32>
      %22 = arith.mulf %21, %21 : vector<2x32xf32>
      %cst_16 = arith.constant dense<0.000000e+00> : vector<32xf32>
      %23 = vector.multi_reduction <add>, %22, %cst_16 [0] : vector<2x32xf32> to vector<32xf32>
      %24 = vector.shape_cast %23 : vector<32xf32> to vector<1x32xf32>
      %cst_17 = arith.constant 2.000000e+00 : f32
      %25 = vector.broadcast %cst_17 : f32 to vector<1x32xf32>
      %26 = arith.divf %24, %25 : vector<1x32xf32>
      %27 = vector.broadcast %19 : vector<1x32xf32> to vector<2x32xf32>
      %28 = arith.subf %15, %27 : vector<2x32xf32>
      %cst_18 = arith.constant 9.99999974E-6 : f32
      %29 = vector.broadcast %cst_18 : f32 to vector<1x32xf32>
      %30 = arith.addf %26, %29 : vector<1x32xf32>
      %31 = math.rsqrt %30 : vector<1x32xf32>
      %32 = vector.broadcast %31 : vector<1x32xf32> to vector<2x32xf32>
      %33 = arith.mulf %28, %32 : vector<2x32xf32>
      %c0_19 = arith.constant 0 : index
      %c0_20 = arith.constant 0 : index
      %34 = vector.load %arg3[%c0_19, %c0_20] : memref<1x32xf32, #tpu.memory_space<vmem>>, vector<1x32xf32>
      %35 = vector.broadcast %34 : vector<1x32xf32> to vector<2x32xf32>
      %36 = arith.mulf %33, %35 : vector<2x32xf32>
      %c0_21 = arith.constant 0 : index
      %c0_22 = arith.constant 0 : index
      %37 = vector.load %arg4[%c0_21, %c0_22] : memref<1x32xf32, #tpu.memory_space<vmem>>, vector<1x32xf32>
      %38 = vector.broadcast %37 : vector<1x32xf32> to vector<2x32xf32>
      %39 = arith.addf %36, %38 : vector<2x32xf32>
      %cst_23 = arith.constant 0.000000e+00 : f32
      %40 = vector.broadcast %cst_23 : f32 to vector<2x32xf32>
      %41 = arith.maximumf %39, %40 : vector<2x32xf32>
      %c0_24 = arith.constant 0 : index
      %c0_25 = arith.constant 0 : index
      %42 = vector.load %arg5[%c0_24, %c0_25] : memref<32x32xf32, #tpu.memory_space<vmem>>, vector<32x32xf32>
      %cst_26 = arith.constant dense<0.000000e+00> : vector<2x32xf32>
      %43 = tpu.matmul %41, %42, %cst_26 {dimension_numbers = #tpu.dot_dimension_numbers<[1], [0], [0], [1], [0, 0, 1, 1], [], []>} : vector<2x32xf32>, vector<32x32xf32>, vector<2x32xf32> -> vector<2x32xf32>
      %c0_27 = arith.constant 0 : index
      %c0_28 = arith.constant 0 : index
      %44 = vector.load %arg6[%c0_27, %c0_28] : memref<1x32xf32, #tpu.memory_space<vmem>>, vector<1x32xf32>
      %45 = vector.broadcast %44 : vector<1x32xf32> to vector<2x32xf32>
      %46 = arith.addf %43, %45 : vector<2x32xf32>
      %c0_29 = arith.constant 0 : index
      %c0_30 = arith.constant 0 : index
      %47 = vector.load %arg7[%c0_29, %c0_30] : memref<2x32xf32, #tpu.memory_space<vmem>>, vector<2x32xf32>
      tpu.vector_store %arg7[%c0_29, %c0_30], %46 {strides = array<i32>} : memref<2x32xf32, #tpu.memory_space<vmem>>, vector<2x32xf32>,
    } else {
    }
    return
  }
  func.func @transform_0(%arg0: i32) -> (i32, i32, i32) {
    %c0_i32 = arith.constant 0 : i32
    %c0_i32_0 = arith.constant 0 : i32
    %c0_i32_1 = arith.constant 0 : i32
    return %c0_i32, %c0_i32_0, %arg0 : i32, i32, i32
  }
  func.func @transform_1(%arg0: i32) -> (i32, i32) {
    %c0_i32 = arith.constant 0 : i32
    %c0_i32_0 = arith.constant 0 : i32
    %c0_i32_1 = arith.constant 0 : i32
    return %c0_i32, %c0_i32_0 : i32, i32
  }
  func.func @transform_2(%arg0: i32) -> (i32, i32) {
    %c0_i32 = arith.constant 0 : i32
    %c0_i32_0 = arith.constant 0 : i32
    %c0_i32_1 = arith.constant 0 : i32
    return %c0_i32, %c0_i32_0 : i32, i32
  }
  func.func @transform_3(%arg0: i32) -> (i32, i32) {
    %c0_i32 = arith.constant 0 : i32
    %c0_i32_0 = arith.constant 0 : i32
    %c0_i32_1 = arith.constant 0 : i32
    return %c0_i32, %c0_i32_0 : i32, i32
  }
  func.func @transform_4(%arg0: i32) -> (i32, i32) {
    %c0_i32 = arith.constant 0 : i32
    %c0_i32_0 = arith.constant 0 : i32
    %c0_i32_1 = arith.constant 0 : i32
    return %c0_i32, %c0_i32_0 : i32, i32
  }
  func.func @transform_5(%arg0: i32) -> (i32, i32) {
    %c0_i32 = arith.constant 0 : i32
    %c0_i32_0 = arith.constant 0 : i32
    %c0_i32_1 = arith.constant 0 : i32
    return %c0_i32, %c0_i32_0 : i32, i32
  }
  func.func @transform_6(%arg0: i32) -> (i32, i32) {
    %c0_i32 = arith.constant 0 : i32
    %c0_i32_0 = arith.constant 0 : i32
    %c0_i32_1 = arith.constant 0 : i32
    return %c0_i32, %c0_i32_0 : i32, i32
  }
}

</mosaic_0001>

<bundles_post_ra>
// kernel: tpu_custom_call.1
= control target key start
LH: loop header
LB: loop body
LE: loop exit
PB: predicated region body
PF: predicated region fallthrough
CT: control target
= control target key end

     0   :  { %11 = vsyncpa [#allocation4], 0  ;;  %s1228_s0 = inlined_call_operand.hbm [shape: f32[2,32,256], index: 0, kind: input, shape index: {}]   ;;  %s1229_s1 = inlined_call_operand.hbm [shape: f32[32,32], index: 1, kind: input, shape index: {}]   ;;  %s1230_s2 = inlined_call_operand.vmem [shape: f32[1,32], index: 2, kind: input, shape index: {}]   ;;  %s1231_s3 = inlined_call_operand.vmem [shape: f32[1,32], index: 3, kind: input, shape index: {}]   ;;  %s1232_s4 = inlined_call_operand.hbm [shape: f32[32,32], index: 4, kind: input, shape index: {}]   ;;  %s1233_s5 = inlined_call_operand.vmem [shape: f32[1,32], index: 5, kind: input, shape index: {}]   ;;  %s1234_s6 = inlined_call_operand.hbm [shape: f32[2,32], index: 6, kind: output, shape index: {}]  }
   0x1   :  { %13 = vsyncpa [#allocation4 + $0x1], 0 }
   0x2   :  { %14 = vsyncpa [#allocation7], 0 }
   0x3   :  { %15 = vsyncpa [#allocation5], 0  ;;  %s1005_s21 = smov 0   ;;  %s1007_s22 = smov 0  }
   0x4   :  { %s1009_s23 = smov 0   ;;  %s1011_s24 = smov 0  }
   0x5 LB: > { %s1024_s25 = sadd.s32 4294967295, %s957_s24   ;;  %s1027_s26 = sadd.s32 1, %s957_s24   ;;  %s957_s24 = sphi %s1011_s24, %s1255_s24   ;;  %s953_s23 = sphi %s1009_s23, %s1254_s23   ;;  %s949_s22 = sphi %s1007_s22, %s1253_s22   ;;  %s945_s21 = sphi %s1005_s21, %s1252_s21  }
   0x6   : > { %s25_s27 = ssub.s32 %s957_s24, %s1027_s26  ;;  %s28_s28 = sadd.s32 1, %s953_s23 }
   0x7   : > { %p26_p0 = scmp.eq.s32.totalorder %s25_s27, 0  ;;  %p35_p1 = scmp.ne.s32.totalorder %s953_s23, %s949_s22 }
   0x8   : > { %p36_p2 = scmp.eq.s32.totalorder %s957_s24, 0  ;;  %p41_p3 = scmp.ne.s32.totalorder %s949_s22, %s945_s21 }
   0x9   : > { %s1037_s29 = scalar_select %p26_p0, %s953_s23, %s28_s28  }
   0xa   : > { %p1039_p4 = por %p36_p2, %p35_p1  ;;  %p1235_p5 = scmp.eq.s32.totalorder %s1024_s25, 0 }
   0xb   : > { %p662_p6 = scmp.ge.s32.totalorder %s957_s24, 1  ;;  %p178_p7 = scmp.lt.s32.totalorder %s957_s24, 3 }
   0xc   : > { %p1048_p8 = por %p1235_p5, %p41_p3  ;;  %s959_s9 = smov [#allocation6]  }
   0xd   : > { %p1053_p10 = pnand %p662_p6, %p178_p7  ;;  %s190_s10 = sshll.u32 %s959_s9, 4  ;;  %s191_s10 = int_to_ptr.vmem [resolvable:$true] %s190_s10 }
   0xe   : > { %s1240_s7 = scalar_select %p1048_p8, 1, 0 }
   0xf   : > { %s1241_s8 = scalar_select %p1053_p10, 1, 0 }
  0x10   : > { %p741_p11 = pneg %p1053_p10  ;;  %p754_p13 = scmp.lt.s32.totalorder %s957_s24, 2 }
  0x11   : > { %s803_s16 = scalar_lea.hbm %s1229_s1, 512 }
  0x12   : > { %p1061_p12 = pnand %p741_p11, %p1235_p5  ;;  %p1069_p0 = pnand %p754_p13, %p1039_p4 }
  0x13   : > { %p804_p1 = scmp.ne.s32.totalorder %s1229_s1, %s803_s16  ;;  %p810_p4 = scmp.lt.u32.totalorder %s803_s16, %s1229_s1 }
  0x14   : > { %s1243_s13 = scalar_select %p1069_p0, 1, 0 }
  0x15   : > { %p805_p2 = pneg %p1061_p12 }
  0x17   : > { %p806_p3 = pnand %p805_p2, %p804_p1 }
  0x19   : > { %p807_p6 = pneg %p806_p3 }
  0x1b   : > { %p812_p7 = pnand %p810_p4, %p807_p6 }
  0x1d   : > { %815 = shalt.err (!%p812_p7)
}
  0x1e   : > { %s816_s21 = scalar_lea.vmem %s191_s10, 512  ;;  %p824_p5 = scmp.lt.s32.totalorder %s191_s10, %s191_s10 }
  0x1f   : > { %p817_p11 = scmp.ne.s32.totalorder %s191_s10, %s816_s21  ;;  %p825_p8 = scmp.lt.s32.totalorder %s816_s21, %s816_s21 }
  0x21   : > { %p819_p13 = pnand %p817_p11, %p805_p2  ;;  %p826_p10 = por %p825_p8, %p824_p5 }
  0x23   : > { %p820_p9 = pneg %p819_p13 }
  0x25   : > { %p827_p0 = pnand %p826_p10, %p820_p9 }
  0x27   : > { %830 = shalt.err (!%p827_p0)
}
  0x28   : > { %s960_s27 = smov 128   ;;  %s961_s28 = smov 8  }
  0x29   : > { %744 = dma.hbm_to_vmem [thread:$0]  (!%p1061_p12), %s1229_s1, 512, %s191_s10, [#allocation7], %s960_s27, %s960_s27, %s961_s28  }
  0x2a   : > { %s962_s14 = smov [#allocation8]   ;;  %s831_s18 = scalar_lea.hbm %s1232_s4, 512 }
  0x2b   : > { %s209_s15 = sshll.u32 %s962_s14, 4  ;;  %p832_p5 = scmp.ne.s32.totalorder %s1232_s4, %s831_s18  ;;  %s210_s15 = int_to_ptr.vmem [resolvable:$true] %s209_s15 }
  0x2c   : > { %p838_p10 = scmp.lt.u32.totalorder %s831_s18, %s1232_s4 }
  0x2d   : > { %p834_p8 = pnand %p832_p5, %p805_p2 }
  0x2f   : > { %p835_p9 = pneg %p834_p8 }
  0x31   : > { %p840_p0 = pnand %p838_p10, %p835_p9 }
  0x33   : > { %843 = shalt.err (!%p840_p0)
}
  0x34   : > { %s844_s10 = scalar_lea.vmem %s210_s15, 512  ;;  %p852_p4 = scmp.lt.s32.totalorder %s210_s15, %s210_s15 }
  0x35   : > { %p845_p1 = scmp.ne.s32.totalorder %s210_s15, %s844_s10  ;;  %p853_p7 = scmp.lt.s32.totalorder %s844_s10, %s844_s10 }
  0x37   : > { %p847_p3 = pnand %p845_p1, %p805_p2  ;;  %p854_p11 = por %p853_p7, %p852_p4 }
  0x39   : > { %p848_p6 = pneg %p847_p3 }
  0x3b   : > { %p855_p13 = pnand %p854_p11, %p848_p6 }
  0x3d   : > { %858 = shalt.err (!%p855_p13)
}
  0x3e   : > { %747 = dma.hbm_to_vmem [thread:$0]  (!%p1061_p12), %s1232_s4, 512, %s210_s15, [#allocation7], %s960_s27, %s960_s27, %s961_s28  }
  0x3f   : > { %s1244_s9 = sand.u32 1, %s953_s23   ;;  %s667_s16 = sshll.u32 %s957_s24, 7 }
  0x40   : > { %s666_s14 = sshll.u32 %s1244_s9, 6  ;;  %s1127_s19 = scalar_lea.hbm %s1228_s0, %s667_s16 }
  0x41   : > { %s230_s11 = scalar_lea.vmem [#allocation3], %s666_s14  ;;  %s1245_s21 = smov %s1244_s9 }
  0x42   : > { %s236_s20 = sshll.u32 %s230_s11, 4  ;;  %s1133_s10 = scalar_lea.sflag [#allocation4], %s1245_s21  ;;  %s1129_s20 = int_to_ptr.vmem [resolvable:$true] %s236_s20 }
  0x43   : > { %s859_s15 = scalar_lea.hbm %s1127_s19, 1024  ;;  %p1246_p2 = scmp.ne.s32.totalorder %s1243_s13, 0 }
  0x44   : > { %p860_p12 = scmp.ne.s32.totalorder %s1127_s19, %s859_s15  ;;  %s864_s30 = scalar_lea.hbm %s1228_s0, 2048 }
  0x45   : > { %p861_p5 = pneg %p1246_p2  ;;  %p865_p10 = scmp.lt.u32.totalorder %s1127_s19, %s1228_s0 }
  0x46   : > { %p866_p0 = scmp.lt.u32.totalorder %s864_s30, %s859_s15  ;;  %p868_p3 = scmp.lt.u32.totalorder %s859_s15, %s1127_s19 }
  0x47   : > { %p862_p8 = pnand %p861_p5, %p860_p12 }
  0x48   : > { %p867_p1 = por %p866_p0, %p865_p10 }
  0x49   : > { %p863_p9 = pneg %p862_p8 }
  0x4a   : > { %p869_p6 = por %p868_p3, %p867_p1 }
  0x4c   : > { %p870_p4 = pnand %p869_p6, %p863_p9 }
  0x4e   : > { %873 = shalt.err (!%p870_p4)
}
  0x4f   : > { %s874_s16 = scalar_lea.vmem %s1129_s20, 1024  ;;  %s963_s17 = smov [#allocation3]  }
  0x50   : > { %p875_p7 = scmp.ne.s32.totalorder %s1129_s20, %s874_s16  ;;  %s879_s18 = sshll.u32 %s963_s17, 4  ;;  %s880_s18 = int_to_ptr.vmem [resolvable:$false] %s879_s18 }
  0x51   : > { %s881_s11 = scalar_lea.vmem %s880_s18, 2048  ;;  %p882_p12 = scmp.lt.s32.totalorder %s1129_s20, %s880_s18 }
  0x52   : > { %p877_p11 = pnand %p875_p7, %p861_p5  ;;  %p883_p8 = scmp.lt.s32.totalorder %s881_s11, %s874_s16 }
  0x54   : > { %p878_p13 = pneg %p877_p11  ;;  %p884_p10 = por %p883_p8, %p882_p12 }
  0x56   : > { %p885_p0 = pnand %p884_p10, %p878_p13 }
  0x58   : > { %888 = shalt.err (!%p885_p0)
}
  0x59   : > { %s964_s21 = smov 256   ;;  %p1247_p5 = scmp.ne.s32.totalorder %s1241_s8, 0 }
  0x5a   : > { %751 = dma.hbm_to_vmem [thread:$0]  (!%p1246_p2), %s1127_s19, 1024, %s1129_s20, %s1133_s10, %s964_s21, %s960_s27, %s961_s28  }
  0x5b   : > { %248 = sbr.rel (%p1247_p5) target bundleno = 790 (0x316), region = 44  ;;  %s250_s15 = sand.u32 (!%p1247_p5), 1, %s949_s22  }
  0x5c   : > { %s669_s24 = sshll.u32 (!%p1247_p5), %s250_s15, 6  ;;  %s251_s12 = scalar_lea.sflag (!%p1247_p5), [#allocation4], %s250_s15 }
  0x5d   : > { %s254_s30 = scalar_lea.vmem (!%p1247_p5), [#allocation3], %s669_s24  ;;  %p1248_p9 = scmp.ne.s32.totalorder (!%p1247_p5), %s1240_s7, 0 }
  0x62   : > { %932 = dma.done.wait (%p1248_p9), %s251_s12, 1024  }
  0x63   : > { %934 = vsyncadd (%p1248_p9), %s251_s12, 4294966272  ;;  %p1249_p1 = scmp.eq.s32.totalorder %s1024_s25, 0 }
  0x65   : > { %936 = dma.done.wait (%p1249_p1), [#allocation7], 1024   ;;  %p1250_p3 = pmov %p1249_p1 }
  0x66   : > { %p1251_p2 = scmp.ne.s32.totalorder %s1024_s25, 0 }
  0x67   : > { %938 = vsyncadd (%p1250_p3), [#allocation7], 4294966272  ;;  %vm290_vm0 = vcmask (!%p1251_p2), 254976   ;;  %v965_v0 = vmov (!%p1251_p2), 0.0  }
  0x68   : > { %289 = sbr.rel (%p1251_p2) target bundleno = 111 (0x6f), region = 60  ;;  %291 = vst.msk [vmem:[#allocation2] sm:$0x3] (!%p1251_p2), %vm290_vm0, %v965_v0 }
  0x6f PF: > { %v297_v1 = vld [vmem:[%s254_s30 + $0x20] sm:$0xff]  ;;  %v298_v3 = vld [vmem:[%s254_s30 + $0x28] sm:$0xff]  ;;  %v299_v5 = vld [vmem:[%s254_s30 + $0x30] sm:$0xff]  ;;  %v325_v9 = vlaneseq  ;;  %vm336_vm1 = vcmask 130112   ;;  %vm343_vm2 = vcmask 195712   ;;  %vm350_vm3 = vcmask 261312  }
  0x70   : > { %v293_v2 = vld [vmem:[%s254_s30] sm:$0xff]  ;;  %309 = vadd.xlane.f32.xlu1 %v297_v1  ;;  %v294_v4 = vld [vmem:[%s254_s30 + $0x8] sm:$0xff]  ;;  %v295_v6 = vld [vmem:[%s254_s30 + $0x10] sm:$0xff]  ;;  %vm371_vm4 = vcmask 1041409   ;;  %vm375_vm5 = vcmask 254976   ;;  %p673_p6 = scmp.ne.s32.totalorder %s1024_s25, 1 }
  0x71   : > { %301 = vadd.xlane.f32.xlu0 %v293_v2  ;;  %v300_v7 = vld [vmem:[%s254_s30 + $0x38] sm:$0xff]  ;;  %v326_v10 = vand.u32 127, %v325_v9  ;;  %v328_v15 = vshrl.u32 %v325_v9, 7  ;;  %v383_v44 = vld [vmem:[#allocation6] sm:$0xff] (!%p673_p6)  ;;  %v384_v45 = vld [vmem:[#allocation6 + $0x8] sm:$0xff] (!%p673_p6)  ;;  %v966_v47 = vmov (!%p673_p6), 0.0|0.0  }
  0x72   : > { %v296_v8 = vld [vmem:[%s254_s30 + $0x18] sm:$0xff]  ;;  %v385_v46 = vld [vmem:[#allocation6 + $0x10] sm:$0xff] (!%p673_p6)  ;;  %715 = vmatprep.subr.bf16.mxu0 (!%p673_p6), %v966_v47  ;;  %v716_v48 = vpack.c.bf16 (!%p673_p6), %v384_v45, %v383_v44  ;;  %vm967_vm6 = vmmov (!%p673_p6), 0   ;;  %v968_v50 = vmov (!%p673_p6), 0.0   ;;  %721 = vmatprep.subr.bf16.mxu1 (!%p673_p6), %v966_v47  ;;  %vm387_vm7 = vcmask (!%p673_p6), 261120   ;;  %v500_v54 = vld [vmem:[#allocation8] sm:$0xff] (!%p673_p6) }
  0x73   : > { %v331_v13 = vadd.s32 4294967288, %v326_v10  ;;  %v338_v14 = vadd.s32 4294967280, %v326_v10  ;;  %v345_v19 = vadd.s32 4294967272, %v326_v10  ;;  %v329_v21 = vsub.s32 %v326_v10, %v328_v15  ;;  %v292_v39 = vld [vmem:[#allocation2] sm:$0x3]  ;;  %701 = vmatprep.mubr.msk.f32.mxu0 (!%p673_p6), %vm967_vm6, %v968_v50  ;;  %712 = vmatprep.mubr.msk.f32.mxu1 (!%p673_p6), %vm967_vm6, %v968_v50  ;;  %v501_v55 = vld [vmem:[#allocation8 + $0x8] sm:$0xff] (!%p673_p6) }
  0x74   : > { %311 = vadd.xlane.f32.xlu1 %v298_v3  ;;  %v386_v49 = vld [vmem:[#allocation6 + $0x18] sm:$0xff] (!%p673_p6)  ;;  %717 = vmatpush3.bf16.msra.mxu0 (!%p673_p6), %v716_v48  ;;  %v722_v56 = vpack.c.bf16 (!%p673_p6), %v501_v55, %v500_v54  ;;  %v502_v57 = vld [vmem:[#allocation8 + $0x10] sm:$0xff] (!%p673_p6) }
  0x75   : > { %303 = vadd.xlane.f32.xlu0 %v294_v4  ;;  %v334_v18 = vsub.s32 %v331_v13, %v328_v15  ;;  %v341_v20 = vsub.s32 %v338_v14, %v328_v15  ;;  %v348_v26 = vsub.s32 %v345_v19, %v328_v15  ;;  %v719_v51 = vpack.c.bf16 (!%p673_p6), %v386_v49, %v385_v46  ;;  %v503_v58 = vld [vmem:[#allocation8 + $0x18] sm:$0xff] (!%p673_p6) }
  0x76   : > { %718 = vmatprep.subr.bf16.mxu0 (!%p673_p6), %v966_v47  ;;  %723 = vmatpush3.bf16.msra.mxu1 (!%p673_p6), %v722_v56  ;;  %v725_v59 = vpack.c.bf16 (!%p673_p6), %v503_v58, %v502_v57 }
  0x77   : > { %724 = vmatprep.subr.bf16.mxu1 (!%p673_p6), %v966_v47 }
  0x78   : > { %313 = vadd.xlane.f32.xlu1 %v299_v5  ;;  %720 = vmatpush3.bf16.msra.mxu0 (!%p673_p6), %v719_v51 }
  0x79   : > { %305 = vadd.xlane.f32.xlu0 %v295_v6 }
  0x7a   : > { %726 = vmatpush3.bf16.msra.mxu1 (!%p673_p6), %v725_v59 }
  0x7c   : > { %315 = vadd.xlane.f32.xlu1 %v300_v7 }
  0x7d   : > { %307 = vadd.xlane.f32.xlu0 %v296_v8 }
  0xfd   : > { %v310_v11 = vpop.xlane.xlu1 %309 }
  0xfe   : > { %v302_v12 = vpop.xlane.xlu0 %301  ;;  %v355_v29 = vrot.slane %v310_v11, %v329_v21 }
  0xff   : > { %v330_v30 = vrot.slane %v302_v12, %v329_v21 }
 0x101   : > { %v312_v16 = vpop.xlane.xlu1 %311 }
 0x102   : > { %v304_v17 = vpop.xlane.xlu0 %303  ;;  %v359_v24 = vrot.slane %v312_v16, %v334_v18 }
 0x103   : > { %v335_v25 = vrot.slane %v304_v17, %v334_v18  ;;  %v675_v18 = vld [vmem:[%s1230_s2] ss:$0 sm:$0xff] (!%p673_p6) }
 0x104   : > { %v360_v33 = vsel %vm336_vm1, %v359_v24, %v355_v29  ;;  %v677_v24 = vld [vmem:[%s1233_s5] ss:$0 sm:$0xff] (!%p673_p6) }
 0x105   : > { %v314_v22 = vpop.xlane.xlu1 %313  ;;  %v337_v34 = vsel %vm336_vm1, %v335_v25, %v330_v30 }
 0x106   : > { %v306_v23 = vpop.xlane.xlu0 %305  ;;  %v364_v27 = vrot.slane %v314_v22, %v341_v20 }
 0x107   : > { %v342_v28 = vrot.slane %v306_v23, %v341_v20  ;;  %v676_v20 = vld [vmem:[%s1231_s3] ss:$0 sm:$0xff] (!%p673_p6) }
 0x108   : > { %v365_v37 = vsel %vm343_vm2, %v364_v27, %v360_v33 }
 0x109   : > { %v316_v31 = vpop.xlane.xlu1 %315  ;;  %v344_v38 = vsel %vm343_vm2, %v342_v28, %v337_v34 }
 0x10a   : > { %v308_v32 = vpop.xlane.xlu0 %307  ;;  %v369_v35 = vrot.slane %v316_v31, %v348_v26 }
 0x10b   : > { %v349_v36 = vrot.slane %v308_v32, %v348_v26  ;;  %380 = sbr.rel (%p673_p6) target bundleno = 765 (0x2fd), region = 64 }
 0x10c   : > { %v370_v40 = vsel %vm350_vm3, %v369_v35, %v365_v37 }
 0x10d   : > { %v351_v41 = vsel %vm350_vm3, %v349_v36, %v344_v38 }
 0x10e   : > { %v372_v42 = vsel %vm371_vm4, %v370_v40, %v351_v41 }
 0x10f   : > { %v374_v43 = vadd.f32 %v372_v42, %v292_v39 }
 0x111   : > { %376 = vst.msk [vmem:[#allocation2] sm:$0x3] %vm375_vm5, %v374_v43 }
 0x118   : > { %v381_v52 = vld [vmem:[#allocation2] sm:$0x3] }
 0x119   : > { %v382_v53 = vmul.f32 0.00390625, %v381_v52 }
 0x11b   : > { %702 = vmatmul.mubr.msk.f32.vlgmr.msra.gmra.mrb[0].mxu0 %vm387_vm7, %v382_v53 }
 0x1ee   : > { %v457_v60 = vpop.f32.mrb[0].mxu0 }
 0x1ef   : > { %v461_v61 = vsel %vm375_vm5, %v457_v60, 0.0  ;;  %v703_v62 = vpop.f32.mrb[1].mxu0 }
 0x1f0   : > { %v462_v63 = vrot.slane %v461_v61, 4 }
 0x1f2   : > { %v463_v0 = vadd.f32 %v462_v63, %v461_v61 }
 0x1f4   : > { %v464_v1 = vrot.slane %v463_v0, 2 }
 0x1f6   : > { %v465_v2 = vadd.f32 %v464_v1, %v463_v0 }
 0x1f8   : > { %v466_v3 = vrot.slane %v465_v2, 1 }
 0x1fa   : > { %v467_v4 = vadd.f32 %v466_v3, %v465_v2 }
 0x1fc   : > { %v469_v5 = vmul.f32 0.5, %v467_v4 }
 0x1fe   : > { %v470_v6 = vsub.f32 %v457_v60, %v469_v5 }
 0x200   : > { %v471_v7 = vmul.f32 %v470_v6, %v470_v6 }
 0x202   : > { %v472_v8 = vsel %vm375_vm5, %v471_v7, 0.0 }
 0x203   : > { %v473_v9 = vrot.slane %v472_v8, 4 }
 0x205   : > { %v474_v10 = vadd.f32 %v473_v9, %v472_v8 }
 0x207   : > { %v475_v11 = vrot.slane %v474_v10, 2 }
 0x209   : > { %v476_v12 = vadd.f32 %v475_v11, %v474_v10 }
 0x20b   : > { %v477_v13 = vrot.slane %v476_v12, 1 }
 0x20d   : > { %v478_v14 = vadd.f32 %v477_v13, %v476_v12 }
 0x20f   : > { %v479_v15 = vmul.f32 0.5, %v478_v14 }
 0x211   : > { %v480_v16 = vadd.f32 1e-05, %v479_v15 }
 0x213   : > { %801 = vrsqrt.f32 %v480_v16 }
 0x21d   : > { %v802_v17 = vpop.eup %801 }
 0x21e   : > { %v482_v19 = vmul.f32 %v802_v17, %v470_v6 }
 0x220   : > { %v490_v21 = vmul.f32 %v675_v18, %v482_v19 }
 0x222   : > { %v498_v22 = vadd.f32 %v676_v20, %v490_v21 }
 0x224   : > { %v499_v23 = vmax.f32 %v498_v22, 0.0 }
 0x226   : > { %713 = vmatmul.mubr.msk.f32.vlgmr.msra.gmra.mrb[0].mxu1 %vm387_vm7, %v499_v23 }
 0x2f9   : > { %v580_v25 = vpop.f32.mrb[0].mxu1 }
 0x2fa   : > { %v581_v26 = vadd.f32 %v677_v24, %v580_v25  ;;  %v714_v27 = vpop.f32.mrb[1].mxu1 }
 0x2fc   : > { %584 = vst.msk [vmem:[#allocation9] sm:$0x3] %vm375_vm5, %v581_v26 }
 0x2fd PF: > { %p757_p4 = scmp.eq.s32.totalorder %s1024_s25, 1  ;;  %s969_s20 = smov [#allocation9]  }
 0x2fe   : > { %s592_s10 = sshll.u32 %s969_s20, 4  ;;  %s593_s10 = int_to_ptr.vmem [resolvable:$true] %s592_s10 }
 0x2ff   : > { %s889_s9 = scalar_lea.vmem %s593_s10, 32  ;;  %p896_p12 = scmp.lt.s32.totalorder %s593_s10, %s593_s10 }
 0x300   : > { %p890_p7 = scmp.ne.s32.totalorder %s593_s10, %s889_s9  ;;  %p897_p8 = scmp.lt.s32.totalorder %s889_s9, %s889_s9 }
 0x302   : > { %p891_p11 = pnand %p890_p7, %p757_p4  ;;  %p898_p10 = por %p897_p8, %p896_p12 }
 0x304   : > { %p892_p13 = pneg %p891_p11 }
 0x306   : > { %p899_p0 = pnand %p898_p10, %p892_p13 }
 0x308   : > { %902 = shalt.err (!%p899_p0)
}
 0x309   : > { %s903_s17 = scalar_lea.hbm %s1234_s6, 32 }
 0x30a   : > { %p904_p5 = scmp.ne.s32.totalorder %s1234_s6, %s903_s17  ;;  %p909_p3 = scmp.lt.u32.totalorder %s903_s17, %s1234_s6 }
 0x30c   : > { %p905_p9 = pnand %p904_p5, %p757_p4 }
 0x30e   : > { %p906_p1 = pneg %p905_p9 }
 0x310   : > { %p911_p2 = pnand %p909_p3, %p906_p1 }
 0x312   : > { %914 = shalt.err (!%p911_p2)
}
 0x313   : > { %738 = dma.vmem_to_hbm [thread:$0]  (%p757_p4), %s593_s10, 32, %s1234_s6, [#allocation5]  }
 0x314   : > { %940 = dma.done.wait (%p757_p4), [#allocation5], 32  }
 0x315   : > { %942 = vsyncadd (%p757_p4), [#allocation5], 4294967264 }
 0x316 PF: > { %p18_p6 = scmp.ge.s32.totalorder %s1027_s26, 4   ;;  %s1252_s21 = smov %s949_s22 }
 0x317   : > { %s1253_s22 = smov %s953_s23  ;;  %s1254_s23 = smov %s1037_s29 }
 0x318   : > { %s1255_s24 = smov %s1027_s26  ;;  %20 = sbr.rel (!%p18_p6) target bundleno = 5 (0x5), region = 97 }
 0x31f   :  { %605 = vsyncpa [#allocation4], 1 }
 0x320   :  { %607 = vsyncpa [#allocation4 + $0x1], 1 }
 0x321   :  { %608 = vsyncpa [#allocation7], 1 }
 0x322   :  { %609 = vsyncpa [#allocation5], 1 }
 0x323   :  { %611 = vsyncpa [#allocation5 + $0x1], 1 }

</bundles_post_ra>
